<compile_context>
chip_gen: v5e
topology: v5e:2x2
jax: 0.10.0
libtpu: 0.0.40
codegen_flags: <defaults>
</compile_context>

<pallas_src>
import functools

import jax
import jax.numpy as jnp
from jax.experimental import pallas as pl
from jax.experimental.pallas import tpu as pltpu


def _round_up(x, m):
    return ((x + m - 1) // m) * m


def _mlp_kernel(x_ref, w1_ref, b1_ref, w2_ref, b2_ref, w3_ref, b3_ref, o_ref):
    """Fused 3-layer MLP: ReLU(xW1+b1) -> ReLU(.W2+b2) -> .W3+b3 (no act).

    x and the weights arrive already in the MXU operand dtype (f32 or bf16,
    pre-cast once in the wrapper); biases stay f32 and are added to the f32
    MXU accumulator.
    """
    x = x_ref[...]
    op_dtype = x.dtype

    h = jnp.dot(x, w1_ref[...], preferred_element_type=jnp.float32) + b1_ref[...]
    # ReLU on the recast value: identical to relu-then-cast (monotone), and on
    # v6e/v7x the bf16 VPU halves the element count. v5e widens it again.
    h = jnp.maximum(h.astype(op_dtype), 0)

    h = jnp.dot(h, w2_ref[...], preferred_element_type=jnp.float32) + b2_ref[...]
    h = jnp.maximum(h.astype(op_dtype), 0)

    y = jnp.dot(h, w3_ref[...], preferred_element_type=jnp.float32) + b3_ref[...]
    o_ref[...] = y.astype(o_ref.dtype)


@functools.partial(jax.jit, static_argnames=("tm", "mxu_dtype"))
def base_comm_forward(hidden_features, params, *, tm=4096,
                      mxu_dtype=jnp.bfloat16):
    """Runs the BaseComm msg_encoder MLP as a single fused Pallas kernel.

    hidden_features: (..., state_dim) float32
    params: dict with w1 (S,H0), b1 (1,H0), w2 (H0,H1), b2 (1,H1),
            w3 (H1,M), b3 (1,M), all float32
    mxu_dtype: MXU operand dtype (default bf16; accumulation is always f32).
               Use jnp.float32 for bit-faithful f32 matmuls.
    returns: (..., msg_dim) float32
    """
    w1, b1 = params["w1"], params["b1"]
    w2, b2 = params["w2"], params["b2"]
    w3, b3 = params["w3"], params["b3"]

    lead_shape = hidden_features.shape[:-1]
    state_dim = hidden_features.shape[-1]
    msg_dim = w3.shape[-1]

    x = hidden_features.reshape(-1, state_dim)
    rows = x.shape[0]

    # Pre-cast MXU operands ONCE here (not per grid step in the kernel):
    # halves x/weight DMA and removes the per-step VPU weight conversion.
    # Biases stay f32 (added to the f32 accumulator).
    if mxu_dtype != jnp.float32:
        x = x.astype(mxu_dtype)
        w1 = w1.astype(mxu_dtype)
        w2 = w2.astype(mxu_dtype)
        w3 = w3.astype(mxu_dtype)

    # Row tile selection:
    #  * large tiles (default 4096 rows) amortize the ~0.35us/step overhead;
    #    VMEM footprint is ~1-2 MiB so the same tile works on v5e/v6e/v7x.
    #  * clamp to the 8-rounded problem so tiny batches don't pay padding.
    #  * if the batch would otherwise be a single grid step but has >=512
    #    rows, cap the tile at half the rows so the ("parallel",) row axis
    #    can shard across v7x's two TensorCores.
    # Row-independence invariant: the ragged last block reads garbage padded
    # rows whose outputs are never written back; keep every op in the kernel
    # strictly row-independent (no cross-row norm/softmax) or this breaks.
    rows8 = _round_up(max(rows, 1), 8)
    tm_eff = max(8, min(_round_up(tm, 8), rows8))
    if rows8 >= 512 and pl.cdiv(rows, tm_eff) < 2:
        tm_eff = _round_up(pl.cdiv(rows8, 2), 8)
    grid = (pl.cdiv(rows, tm_eff),)

    out = pl.pallas_call(
        _mlp_kernel,
        out_shape=jax.ShapeDtypeStruct((rows, msg_dim), jnp.float32),
        grid_spec=pltpu.PrefetchScalarGridSpec(
            num_scalar_prefetch=0,
            grid=grid,
            in_specs=[
                # x: tiled over rows (ragged last block handled by Pallas).
                pl.BlockSpec((tm_eff, state_dim), lambda i: (i, 0)),
                # Weights / biases: constant block index -> resident in VMEM,
                # Pallas skips re-copies after the first grid step.
                pl.BlockSpec(w1.shape, lambda i: (0, 0)),
                pl.BlockSpec(b1.shape, lambda i: (0, 0)),
                pl.BlockSpec(w2.shape, lambda i: (0, 0)),
                pl.BlockSpec(b2.shape, lambda i: (0, 0)),
                pl.BlockSpec(w3.shape, lambda i: (0, 0)),
                pl.BlockSpec(b3.shape, lambda i: (0, 0)),
            ],
            out_specs=pl.BlockSpec((tm_eff, msg_dim), lambda i: (i, 0)),
        ),
        compiler_params=pltpu.CompilerParams(
            dimension_semantics=("parallel",),  # megacore shards the row grid
        ),
    )(x, w1, b1, w2, b2, w3, b3)

    return out.reshape(*lead_shape, msg_dim)


def init_base_comm_params(key, state_dim, hidden_sizes_comm, msg_dim):
    """Parameter init matching the module's layer shapes.

    Weights are stored as (in_dim, out_dim) == PyTorch Linear weight.T.
    """
    dims = [state_dim] + list(hidden_sizes_comm) + [msg_dim]
    params = {}
    for idx in range(len(dims) - 1):
        key, kw, kb = jax.random.split(key, 3)
        fan_in, fan_out = dims[idx], dims[idx + 1]
        bound = 1.0 / jnp.sqrt(fan_in)
        w = jax.random.uniform(kw, (fan_in, fan_out), jnp.float32, -bound, bound)
        b = jax.random.uniform(kb, (1, fan_out), jnp.float32, -bound, bound)
        params[f"w{idx + 1}"] = w
        params[f"b{idx + 1}"] = b
    return params


def _reference_forward(hidden_features, params):
    """Pure-JAX reference for correctness checking."""
    x = hidden_features
    x = jnp.maximum(x @ params["w1"] + params["b1"][0], 0.0)
    x = jnp.maximum(x @ params["w2"] + params["b2"][0], 0.0)
    return x @ params["w3"] + params["b3"][0]


if __name__ == "__main__":
    state_dim = 32
    n_agents = 4
    hidden_sizes_comm = (64, 64)
    msg_dim = 16

    key = jax.random.PRNGKey(0)
    k_params, k_x1, k_x2, k_x3 = jax.random.split(key, 4)
    params = init_base_comm_params(k_params, state_dim, hidden_sizes_comm, msg_dim)

    # Small case: (batch=2, n_agents=4, state_dim=32) -> rows = 8.
    hf_small = jax.random.normal(k_x1, (2, n_agents, state_dim), dtype=jnp.float32)
    ref_small = _reference_forward(hf_small, params)
    # Exact f32 MXU path (bit-faithful to the module's f32 forward).
    out_small_f32 = jax.block_until_ready(
        base_comm_forward(hf_small, params, mxu_dtype=jnp.float32))
    assert out_small_f32.shape == (2, n_agents, msg_dim), out_small_f32.shape
    assert jnp.allclose(out_small_f32, ref_small, atol=1e-4, rtol=1e-4), (
        float(jnp.max(jnp.abs(out_small_f32 - ref_small))))
    # Default bf16-operand path (native MXU rate), looser tolerance.
    out_small = jax.block_until_ready(base_comm_forward(hf_small, params))
    assert jnp.allclose(out_small, ref_small, atol=2e-2, rtol=2e-2), (
        float(jnp.max(jnp.abs(out_small - ref_small))))

    # Ragged case: rows = 65*4 = 260 (not a multiple of 8) exercises the
    # no-host-pad / partial-block path.
    hf_ragged = jax.random.normal(k_x2, (65, n_agents, state_dim), dtype=jnp.float32)
    ref_ragged = _reference_forward(hf_ragged, params)
    out_ragged = jax.block_until_ready(base_comm_forward(hf_ragged, params))
    assert out_ragged.shape == (65, n_agents, msg_dim), out_ragged.shape
    assert jnp.allclose(out_ragged, ref_ragged, atol=2e-2, rtol=2e-2), (
        float(jnp.max(jnp.abs(out_ragged - ref_ragged))))
    out_ragged_f32 = jax.block_until_ready(
        base_comm_forward(hf_ragged, params, mxu_dtype=jnp.float32))
    assert jnp.allclose(out_ragged_f32, ref_ragged, atol=1e-4, rtol=1e-4), (
        float(jnp.max(jnp.abs(out_ragged_f32 - ref_ragged))))

    # Two-grid-step case: rows = 130*4 = 520 >= 512, so the tile is capped at
    # half the rows (>=2 steps -> both v7x TensorCores get work) and the last
    # block is ragged.
    hf_multi = jax.random.normal(k_x3, (130, n_agents, state_dim), dtype=jnp.float32)
    ref_multi = _reference_forward(hf_multi, params)
    out_multi = jax.block_until_ready(base_comm_forward(hf_multi, params))
    assert out_multi.shape == (130, n_agents, msg_dim), out_multi.shape
    assert jnp.allclose(out_multi, ref_multi, atol=2e-2, rtol=2e-2), (
        float(jnp.max(jnp.abs(out_multi - ref_multi))))

    print("KERNEL_OK")
</pallas_src>

<mosaic_0001>
module attributes {stable_mosaic.version = 11 : i64} {
  func.func @_mlp_kernel(%arg0: i32, %arg1: memref<8x32xf32, #tpu.memory_space<vmem>>, %arg2: memref<32x64xf32, #tpu.memory_space<vmem>>, %arg3: memref<1x64xf32, #tpu.memory_space<vmem>>, %arg4: memref<64x64xf32, #tpu.memory_space<vmem>>, %arg5: memref<1x64xf32, #tpu.memory_space<vmem>>, %arg6: memref<64x16xf32, #tpu.memory_space<vmem>>, %arg7: memref<1x16xf32, #tpu.memory_space<vmem>>, %arg8: memref<8x16xf32, #tpu.memory_space<vmem>>) attributes {dimension_semantics = [#tpu.dimension_semantics<parallel>], iteration_bounds = array<i64: 1>, scalar_prefetch = 0 : i64, scratch_operands = 0 : i64, tpu.core_type = #tpu.core_type<tc>, window_params = [{transform_indices = @transform_0, window_bounds = array<i64: 8, 32>}, {pipeline_mode = #tpu.pipeline_mode<synchronous>, transform_indices = @transform_1, window_bounds = array<i64: 32, 64>}, {pipeline_mode = #tpu.pipeline_mode<synchronous>, transform_indices = @transform_2, window_bounds = array<i64: 1, 64>}, {pipeline_mode = #tpu.pipeline_mode<synchronous>, transform_indices = @transform_3, window_bounds = array<i64: 64, 64>}, {pipeline_mode = #tpu.pipeline_mode<synchronous>, transform_indices = @transform_4, window_bounds = array<i64: 1, 64>}, {pipeline_mode = #tpu.pipeline_mode<synchronous>, transform_indices = @transform_5, window_bounds = array<i64: 64, 16>}, {pipeline_mode = #tpu.pipeline_mode<synchronous>, transform_indices = @transform_6, window_bounds = array<i64: 1, 16>}, {transform_indices = @transform_7, window_bounds = array<i64: 8, 16>}]} {
    %c0 = arith.constant 0 : index
    %c0_0 = arith.constant 0 : index
    %0 = vector.load %arg1[%c0, %c0_0] : memref<8x32xf32, #tpu.memory_space<vmem>>, vector<8x32xf32>
    %c0_1 = arith.constant 0 : index
    %c0_2 = arith.constant 0 : index
    %1 = vector.load %arg2[%c0_1, %c0_2] : memref<32x64xf32, #tpu.memory_space<vmem>>, vector<32x64xf32>
    %cst = arith.constant dense<0.000000e+00> : vector<8x64xf32>
    %2 = tpu.matmul %0, %1, %cst {dimension_numbers = #tpu.dot_dimension_numbers<[1], [0], [0], [1], [0, 0, 1, 1], [], []>} : vector<8x32xf32>, vector<32x64xf32>, vector<8x64xf32> -> vector<8x64xf32>
    %c0_3 = arith.constant 0 : index
    %c0_4 = arith.constant 0 : index
    %3 = vector.load %arg3[%c0_3, %c0_4] : memref<1x64xf32, #tpu.memory_space<vmem>>, vector<1x64xf32>
    %4 = vector.broadcast %3 : vector<1x64xf32> to vector<8x64xf32>
    %5 = arith.addf %2, %4 : vector<8x64xf32>
    %cst_5 = arith.constant 0.000000e+00 : f32
    %6 = vector.broadcast %cst_5 : f32 to vector<8x64xf32>
    %7 = arith.maximumf %5, %6 : vector<8x64xf32>
    %c0_6 = arith.constant 0 : index
    %c0_7 = arith.constant 0 : index
    %8 = vector.load %arg4[%c0_6, %c0_7] : memref<64x64xf32, #tpu.memory_space<vmem>>, vector<64x64xf32>
    %cst_8 = arith.constant dense<0.000000e+00> : vector<8x64xf32>
    %9 = tpu.matmul %7, %8, %cst_8 {dimension_numbers = #tpu.dot_dimension_numbers<[1], [0], [0], [1], [0, 0, 1, 1], [], []>} : vector<8x64xf32>, vector<64x64xf32>, vector<8x64xf32> -> vector<8x64xf32>
    %c0_9 = arith.constant 0 : index
    %c0_10 = arith.constant 0 : index
    %10 = vector.load %arg5[%c0_9, %c0_10] : memref<1x64xf32, #tpu.memory_space<vmem>>, vector<1x64xf32>
    %11 = vector.broadcast %10 : vector<1x64xf32> to vector<8x64xf32>
    %12 = arith.addf %9, %11 : vector<8x64xf32>
    %cst_11 = arith.constant 0.000000e+00 : f32
    %13 = vector.broadcast %cst_11 : f32 to vector<8x64xf32>
    %14 = arith.maximumf %12, %13 : vector<8x64xf32>
    %c0_12 = arith.constant 0 : index
    %c0_13 = arith.constant 0 : index
    %15 = vector.load %arg6[%c0_12, %c0_13] : memref<64x16xf32, #tpu.memory_space<vmem>>, vector<64x16xf32>
    %cst_14 = arith.constant dense<0.000000e+00> : vector<8x16xf32>
    %16 = tpu.matmul %14, %15, %cst_14 {dimension_numbers = #tpu.dot_dimension_numbers<[1], [0], [0], [1], [0, 0, 1, 1], [], []>} : vector<8x64xf32>, vector<64x16xf32>, vector<8x16xf32> -> vector<8x16xf32>
    %c0_15 = arith.constant 0 : index
    %c0_16 = arith.constant 0 : index
    %17 = vector.load %arg7[%c0_15, %c0_16] : memref<1x16xf32, #tpu.memory_space<vmem>>, vector<1x16xf32>
    %18 = vector.broadcast %17 : vector<1x16xf32> to vector<8x16xf32>
    %19 = arith.addf %16, %18 : vector<8x16xf32>
    %c0_17 = arith.constant 0 : index
    %c0_18 = arith.constant 0 : index
    %20 = vector.load %arg8[%c0_17, %c0_18] : memref<8x16xf32, #tpu.memory_space<vmem>>, vector<8x16xf32>
    tpu.vector_store %arg8[%c0_17, %c0_18], %19 {strides = array<i32>} : memref<8x16xf32, #tpu.memory_space<vmem>>, vector<8x16xf32>,
    return
  }
  func.func @transform_0(%arg0: i32) -> (i32, i32) {
    %c0_i32 = arith.constant 0 : i32
    %c0_i32_0 = arith.constant 0 : i32
    return %arg0, %c0_i32 : i32, i32
  }
  func.func @transform_1(%arg0: i32) -> (i32, i32) {
    %c0_i32 = arith.constant 0 : i32
    %c0_i32_0 = arith.constant 0 : i32
    %c0_i32_1 = arith.constant 0 : i32
    return %c0_i32, %c0_i32_0 : i32, i32
  }
  func.func @transform_2(%arg0: i32) -> (i32, i32) {
    %c0_i32 = arith.constant 0 : i32
    %c0_i32_0 = arith.constant 0 : i32
    %c0_i32_1 = arith.constant 0 : i32
    return %c0_i32, %c0_i32_0 : i32, i32
  }
  func.func @transform_3(%arg0: i32) -> (i32, i32) {
    %c0_i32 = arith.constant 0 : i32
    %c0_i32_0 = arith.constant 0 : i32
    %c0_i32_1 = arith.constant 0 : i32
    return %c0_i32, %c0_i32_0 : i32, i32
  }
  func.func @transform_4(%arg0: i32) -> (i32, i32) {
    %c0_i32 = arith.constant 0 : i32
    %c0_i32_0 = arith.constant 0 : i32
    %c0_i32_1 = arith.constant 0 : i32
    return %c0_i32, %c0_i32_0 : i32, i32
  }
  func.func @transform_5(%arg0: i32) -> (i32, i32) {
    %c0_i32 = arith.constant 0 : i32
    %c0_i32_0 = arith.constant 0 : i32
    %c0_i32_1 = arith.constant 0 : i32
    return %c0_i32, %c0_i32_0 : i32, i32
  }
  func.func @transform_6(%arg0: i32) -> (i32, i32) {
    %c0_i32 = arith.constant 0 : i32
    %c0_i32_0 = arith.constant 0 : i32
    %c0_i32_1 = arith.constant 0 : i32
    return %c0_i32, %c0_i32_0 : i32, i32
  }
  func.func @transform_7(%arg0: i32) -> (i32, i32) {
    %c0_i32 = arith.constant 0 : i32
    %c0_i32_0 = arith.constant 0 : i32
    return %arg0, %c0_i32 : i32, i32
  }
}

</mosaic_0001>

<bundles_post_ra>
// kernel: base_comm_forward.1
= control target key start
LH: loop header
LB: loop body
LE: loop exit
PB: predicated region body
PF: predicated region fallthrough
CT: control target
= control target key end

     0   :  { %12 = vsyncpa [#allocation3], 0  ;;  %s340_s0 = inlined_call_operand.vmem [shape: f32[8,32], index: 0, kind: input, shape index: {}]   ;;  %s341_s1 = inlined_call_operand.hbm [shape: f32[32,64], index: 1, kind: input, shape index: {}]   ;;  %s342_s2 = inlined_call_operand.vmem [shape: f32[1,64], index: 2, kind: input, shape index: {}]   ;;  %s343_s3 = inlined_call_operand.vmem [shape: f32[64,64], index: 3, kind: input, shape index: {}]   ;;  %s344_s4 = inlined_call_operand.vmem [shape: f32[1,64], index: 4, kind: input, shape index: {}]   ;;  %s345_s5 = inlined_call_operand.vmem [shape: f32[64,16], index: 5, kind: input, shape index: {}]   ;;  %s346_s6 = inlined_call_operand.vmem [shape: f32[1,16], index: 6, kind: input, shape index: {}]   ;;  %s347_s7 = inlined_call_operand.hbm [shape: f32[8,16], index: 7, kind: output, shape index: {}]  }
   0x1   :  { %13 = vsyncpa [#allocation4], 0  ;;  %s20_s26 = sshll.u32 %s341_s1, 4  ;;  %s230_s27 = smov [#allocation2]   ;;  %s21_s26 = int_to_ptr.hbm [resolvable:$true] %s20_s26 }
   0x2   :  { %s22_s28 = sshll.u32 %s230_s27, 4  ;;  %s231_s29 = smov 128   ;;  %s23_s28 = int_to_ptr.vmem [resolvable:$true] %s22_s28 }
   0x3   :  { %s232_s30 = smov 8  }
   0x4   :  { %28 = dma.hbm_to_vmem [thread:$0]  %s21_s26, 512, %s23_s28, [#allocation3], %s231_s29, %s231_s29, %s232_s30  }
   0x5   :  { %226 = dma.done.wait [#allocation3], 512  }
   0x6   :  { %227 = vsyncadd [#allocation3], 4294966784  ;;  %v47_v0 = vld [vmem:[#allocation2 + $0x18] sm:$0xff]  ;;  %v46_v1 = vld [vmem:[#allocation2 + $0x10] sm:$0xff]  ;;  %vm52_vm0 = vcmask 261120   ;;  %vm89_vm1 = vcmask 523264  }
   0x7   :  { %68 = vmatpush.msra.mxu0 %v47_v0  ;;  %v84_v2 = vld [vmem:[%s343_s3 + $0x38] sm:$0xff]  ;;  %v45_v3 = vld [vmem:[#allocation2 + $0x8] sm:$0xff]  ;;  %v83_v4 = vld [vmem:[%s343_s3 + $0x30] sm:$0xff]  ;;  %s233_s20 = smov [#allocation5]   ;;  %s158_s23 = sshll.u32 %s347_s7, 4  ;;  %vm149_vm2 = vcmask 130048   ;;  %s159_s23 = int_to_ptr.hbm [resolvable:$true] %s158_s23 }
   0x8   :  { %101 = vmatpush.msra.mxu1 %v84_v2  ;;  %v82_v5 = vld [vmem:[%s343_s3 + $0x28] sm:$0xff]  ;;  %v44_v6 = vld [vmem:[#allocation2] sm:$0xff]  ;;  %v80_v9 = vld [vmem:[%s343_s3 + $0x18] sm:$0xff] }
   0x9   :  { %69 = vmatpush.msra.mxu0 %v46_v1  ;;  %v43_v7 = vld [vmem:[%s340_s0] sm:$0xff]  ;;  %v79_v10 = vld [vmem:[%s343_s3 + $0x10] sm:$0xff]  ;;  %v78_v11 = vld [vmem:[%s343_s3 + $0x8] sm:$0xff]  ;;  %s156_s0 = sshll.u32 %s233_s20, 4  ;;  %s157_s0 = int_to_ptr.vmem [resolvable:$true] %s156_s0 }
   0xa   :  { %102 = vmatpush.msra.mxu1 %v83_v4  ;;  %v81_v8 = vld [vmem:[%s343_s3 + $0x20] sm:$0xff]  ;;  %v121_v13 = vld [vmem:[%s345_s5 + $0x38] sm:$0xff]  ;;  %v120_v14 = vld [vmem:[%s345_s5 + $0x30] sm:$0xff] }
   0xb   :  { %70 = vmatpush.msra.mxu0 %v45_v3  ;;  %v77_v12 = vld [vmem:[%s343_s3] sm:$0xff]  ;;  %137 = vmatpush.msra.mxu2 %v121_v13  ;;  %v119_v15 = vld [vmem:[%s345_s5 + $0x28] sm:$0xff]  ;;  %v117_v17 = vld [vmem:[%s345_s5 + $0x18] sm:$0xff] }
   0xc   :  { %103 = vmatpush.msra.mxu1 %v82_v5  ;;  %v118_v16 = vld [vmem:[%s345_s5 + $0x20] sm:$0xff]  ;;  %v116_v22 = vld [vmem:[%s345_s5 + $0x10] sm:$0xff]  ;;  %v115_v23 = vld [vmem:[%s345_s5 + $0x8] sm:$0xff] }
   0xd   :  { %71 = vmatpush.msra.mxu0 %v44_v6  ;;  %138 = vmatpush.msra.mxu2 %v120_v14  ;;  %v175_v18 = vld [vmem:[%s342_s2] ss:$0 sm:$0xff] }
   0xe   :  { %168 = vmatmul.msk.f32.vlgmr.msra.gmra.mxu0 %vm52_vm0, %v43_v7  ;;  %104 = vmatpush.msra.mxu1 %v81_v8  ;;  %v114_v24 = vld [vmem:[%s345_s5] sm:$0xff] }
   0xf   :  { %139 = vmatpush.msra.mxu2 %v119_v15  ;;  %v176_v25 = vld [vmem:[%s344_s4] ss:$0 sm:$0xff] }
  0x10   :  { %105 = vmatpush.msra.mxu1 %v80_v9  ;;  %v177_v29 = vld [vmem:[%s346_s6] ss:$0 sm:$0xff] }
  0x11   :  { %140 = vmatpush.msra.mxu2 %v118_v16 }
  0x12   :  { %106 = vmatpush.msra.mxu1 %v79_v10 }
  0x13   :  { %141 = vmatpush.msra.mxu2 %v117_v17 }
  0x14   :  { %107 = vmatpush.msra.mxu1 %v78_v11 }
  0x15   :  { %142 = vmatpush.msra.mxu2 %v116_v22 }
  0x16   :  { %108 = vmatpush.msra.mxu1 %v77_v12 }
  0x17   :  { %143 = vmatpush.msra.mxu2 %v115_v23 }
  0x19   :  { %144 = vmatpush.msra.mxu2 %v114_v24 }
  0x8b   :  { %v73_v19 = vpop.f32.mrf.mxu0 }
  0x8c   :  { %v74_v20 = vadd.f32 %v175_v18, %v73_v19 }
  0x8e   :  { %v76_v21 = vmax.f32 %v74_v20, 0.0 }
  0x90   :  { %169 = vmatmul.msk.f32.vlgmr.msra.gmra.mxu1 %vm89_vm1, %v76_v21 }
 0x10d   :  { %v110_v26 = vpop.f32.mrf.mxu1 }
 0x10e   :  { %v111_v27 = vadd.f32 %v176_v25, %v110_v26 }
 0x110   :  { %v113_v28 = vmax.f32 %v111_v27, 0.0 }
 0x112   :  { %170 = vmatmul.msk.f32.vlgmr.msra.gmra.mxu2 %vm89_vm1, %v113_v28 }
 0x195   :  { %v146_v30 = vpop.f32.mrf.mxu2 }
 0x196   :  { %v147_v31 = vadd.f32 %v177_v29, %v146_v30 }
 0x198   :  { %150 = vst.msk [vmem:[#allocation5] sm:$0xff] %vm149_vm2, %v147_v31 }
 0x199   :  { %161 = dma.vmem_to_hbm [thread:$0]  %s157_s0, 128, %s159_s23, [#allocation4]  }
 0x19a   :  { %228 = dma.done.wait [#allocation4], 128  }
 0x19b   :  { %229 = vsyncadd [#allocation4], 4294967168 }
 0x19c   :  { %166 = vsyncpa [#allocation3], 1 }
 0x19d   :  { %167 = vsyncpa [#allocation4], 1 }

</bundles_post_ra>
